<compile_context>
chip_gen: v7x
topology: tpu7x:2x2x1
jax: 0.10.0
libtpu: 0.0.40
codegen_flags: <defaults>
</compile_context>

<pallas_src>
import jax
import jax.numpy as jnp
from jax.experimental import pallas as pl
from jax.experimental.pallas import tpu as pltpu

_LANES = 128
_MAX_TILE_ROWS = 1024  # 1024 x 128 f32 = 512 KiB per input tile (well under VMEM)


def _rel_kernel(pred_ref, targ_ref, sum_ref, cnt_ref):
    # pred_ref / targ_ref: (TR, 128) lane-dense tile (TR is a multiple of 8).
    # sum_ref / cnt_ref:   (1, 8, 128) per-block partial sum / valid-count.
    t = targ_ref[...].astype(jnp.float32)
    p = pred_ref[...].astype(jnp.float32)
    valid = t > 0.0
    safe_t = jnp.where(valid, t, jnp.float32(1.0))
    rel = jnp.where(valid, jnp.abs(t - p) / safe_t, jnp.float32(0.0))
    cnt = jnp.where(valid, jnp.float32(1.0), jnp.float32(0.0))
    tr = rel.shape[0]
    # Sublane-split reshape is layout-preserving; the axis-0 sum is pure VPU
    # vreg adds -- no XLU cross-lane reduce and no sub-vreg masked store in
    # the hot loop.
    sum_ref[...] = jnp.sum(rel.reshape(tr // 8, 8, _LANES), axis=0, keepdims=True)
    cnt_ref[...] = jnp.sum(cnt.reshape(tr // 8, 8, _LANES), axis=0, keepdims=True)


def rel_loss(pred, target):
    """Masked relative error: mean(|t - p| / t) over elements where t > 0."""
    assert pred.shape == target.shape, "inconsistent dimensions"
    n = pred.size

    rows = pl.cdiv(n, _LANES)
    rows = max(8, ((rows + 7) // 8) * 8)          # multiple of 8 sublanes
    tr = min(_MAX_TILE_ROWS, rows)                # rows per grid step (mult. of 8)
    rows_pad = ((rows + tr - 1) // tr) * tr
    total = rows_pad * _LANES
    grid = rows_pad // tr

    p_flat = pred.reshape(-1)
    t_flat = target.reshape(-1)
    if total != n:
        # Zero padding: padded targets fail (t > 0), so they are ignored.
        p_flat = jnp.pad(p_flat, (0, total - n))
        t_flat = jnp.pad(t_flat, (0, total - n))
    p2 = p_flat.reshape(rows_pad, _LANES)
    t2 = t_flat.reshape(rows_pad, _LANES)

    sums, cnts = pl.pallas_call(
        _rel_kernel,
        out_shape=(
            jax.ShapeDtypeStruct((grid, 8, _LANES), jnp.float32),
            jax.ShapeDtypeStruct((grid, 8, _LANES), jnp.float32),
        ),
        grid_spec=pltpu.PrefetchScalarGridSpec(
            num_scalar_prefetch=0,
            grid=(grid,),
            in_specs=[
                pl.BlockSpec((tr, _LANES), lambda i: (i, 0)),
                pl.BlockSpec((tr, _LANES), lambda i: (i, 0)),
            ],
            out_specs=[
                pl.BlockSpec((1, 8, _LANES), lambda i: (i, 0, 0)),
                pl.BlockSpec((1, 8, _LANES), lambda i: (i, 0, 0)),
            ],
        ),
        compiler_params=pltpu.CompilerParams(
            # Independent partial-sum blocks -> v7x can shard across both TCs.
            dimension_semantics=("parallel",),
        ),
    )(p2, t2)

    # Tiny final reduction (grid * 8 * 128 elements) in glue.
    return jnp.sum(sums) / jnp.sum(cnts)


if __name__ == "__main__":
    key = jax.random.PRNGKey(0)
    k1, k2 = jax.random.split(key)
    B, C, H, W = 2, 4, 16, 16
    pred = jax.random.normal(k1, (B, C, H, W), dtype=jnp.float32)
    target = jax.random.normal(k2, (B, C, H, W), dtype=jnp.float32)  # ~half valid

    loss = rel_loss(pred, target)
    jax.block_until_ready(loss)

    # Pure-JAX reference with identical semantics to the PyTorch module.
    valid = target > 0
    safe_t = jnp.where(valid, target, 1.0)
    diff = jnp.where(valid, jnp.abs(target - pred) / safe_t, 0.0)
    ref = jnp.sum(diff) / jnp.sum(valid)

    assert jnp.allclose(loss, ref, rtol=1e-5, atol=1e-6), (loss, ref)
    print("KERNEL_OK")
</pallas_src>

<mosaic_0001>
module attributes {stable_mosaic.version = 11 : i64} {
  func.func @_rel_kernel(%arg0: i32, %arg1: memref<16x128xf32, #tpu.memory_space<vmem>>, %arg2: memref<16x128xf32, #tpu.memory_space<vmem>>, %arg3: memref<1x8x128xf32, #tpu.memory_space<vmem>>, %arg4: memref<1x8x128xf32, #tpu.memory_space<vmem>>) attributes {dimension_semantics = [#tpu.dimension_semantics<parallel>], iteration_bounds = array<i64: 1>, scalar_prefetch = 0 : i64, scratch_operands = 0 : i64, tpu.core_type = #tpu.core_type<tc>, window_params = [{transform_indices = @transform_0, window_bounds = array<i64: 16, 128>}, {transform_indices = @transform_1, window_bounds = array<i64: 16, 128>}, {transform_indices = @transform_2, window_bounds = array<i64: 1, 8, 128>}, {transform_indices = @transform_3, window_bounds = array<i64: 1, 8, 128>}]} {
    %c0 = arith.constant 0 : index
    %c0_0 = arith.constant 0 : index
    %0 = vector.load %arg2[%c0, %c0_0] : memref<16x128xf32, #tpu.memory_space<vmem>>, vector<16x128xf32>
    %c0_1 = arith.constant 0 : index
    %c0_2 = arith.constant 0 : index
    %1 = vector.load %arg1[%c0_1, %c0_2] : memref<16x128xf32, #tpu.memory_space<vmem>>, vector<16x128xf32>
    %cst = arith.constant 0.000000e+00 : f32
    %2 = vector.broadcast %cst : f32 to vector<16x128xf32>
    %3 = arith.cmpf ogt, %0, %2 : vector<16x128xf32>
    %cst_3 = arith.constant 1.000000e+00 : f32
    %4 = vector.broadcast %cst_3 : f32 to vector<16x128xf32>
    %5 = arith.select %3, %0, %4 : vector<16x128xi1>, vector<16x128xf32>
    %6 = arith.subf %0, %1 : vector<16x128xf32>
    %7 = math.absf %6 : vector<16x128xf32>
    %8 = arith.divf %7, %5 : vector<16x128xf32>
    %cst_4 = arith.constant 0.000000e+00 : f32
    %9 = vector.broadcast %cst_4 : f32 to vector<16x128xf32>
    %10 = arith.select %3, %8, %9 : vector<16x128xi1>, vector<16x128xf32>
    %cst_5 = arith.constant 1.000000e+00 : f32
    %cst_6 = arith.constant 0.000000e+00 : f32
    %11 = vector.broadcast %cst_5 : f32 to vector<16x128xf32>
    %12 = vector.broadcast %cst_6 : f32 to vector<16x128xf32>
    %13 = arith.select %3, %11, %12 : vector<16x128xi1>, vector<16x128xf32>
    %14 = vector.shape_cast %10 : vector<16x128xf32> to vector<2x8x128xf32>
    %cst_7 = arith.constant dense<0.000000e+00> : vector<8x128xf32>
    %15 = vector.multi_reduction <add>, %14, %cst_7 [0] : vector<2x8x128xf32> to vector<8x128xf32>
    %16 = vector.shape_cast %15 : vector<8x128xf32> to vector<1x8x128xf32>
    %c0_8 = arith.constant 0 : index
    %c0_9 = arith.constant 0 : index
    %c0_10 = arith.constant 0 : index
    %17 = vector.load %arg3[%c0_8, %c0_9, %c0_10] : memref<1x8x128xf32, #tpu.memory_space<vmem>>, vector<1x8x128xf32>
    tpu.vector_store %arg3[%c0_8, %c0_9, %c0_10], %16 {strides = array<i32>} : memref<1x8x128xf32, #tpu.memory_space<vmem>>, vector<1x8x128xf32>,
    %18 = vector.shape_cast %13 : vector<16x128xf32> to vector<2x8x128xf32>
    %cst_11 = arith.constant dense<0.000000e+00> : vector<8x128xf32>
    %19 = vector.multi_reduction <add>, %18, %cst_11 [0] : vector<2x8x128xf32> to vector<8x128xf32>
    %20 = vector.shape_cast %19 : vector<8x128xf32> to vector<1x8x128xf32>
    %c0_12 = arith.constant 0 : index
    %c0_13 = arith.constant 0 : index
    %c0_14 = arith.constant 0 : index
    %21 = vector.load %arg4[%c0_12, %c0_13, %c0_14] : memref<1x8x128xf32, #tpu.memory_space<vmem>>, vector<1x8x128xf32>
    tpu.vector_store %arg4[%c0_12, %c0_13, %c0_14], %20 {strides = array<i32>} : memref<1x8x128xf32, #tpu.memory_space<vmem>>, vector<1x8x128xf32>,
    return
  }
  func.func @transform_0(%arg0: i32) -> (i32, i32) {
    %c0_i32 = arith.constant 0 : i32
    %c0_i32_0 = arith.constant 0 : i32
    return %arg0, %c0_i32 : i32, i32
  }
  func.func @transform_1(%arg0: i32) -> (i32, i32) {
    %c0_i32 = arith.constant 0 : i32
    %c0_i32_0 = arith.constant 0 : i32
    return %arg0, %c0_i32 : i32, i32
  }
  func.func @transform_2(%arg0: i32) -> (i32, i32, i32) {
    %c0_i32 = arith.constant 0 : i32
    %c0_i32_0 = arith.constant 0 : i32
    %c0_i32_1 = arith.constant 0 : i32
    return %arg0, %c0_i32, %c0_i32_0 : i32, i32, i32
  }
  func.func @transform_3(%arg0: i32) -> (i32, i32, i32) {
    %c0_i32 = arith.constant 0 : i32
    %c0_i32_0 = arith.constant 0 : i32
    %c0_i32_1 = arith.constant 0 : i32
    return %arg0, %c0_i32, %c0_i32_0 : i32, i32, i32
  }
}

</mosaic_0001>

<bundles_post_ra>
// kernel: tpu_custom_call.1
= control target key start
LH: loop header
LB: loop body
LE: loop exit
PB: predicated region body
PF: predicated region fallthrough
CT: control target
= control target key end

     0   :  { %9 = vsyncpa [#allocation3], 0  ;;  %s285_s0 = inlined_call_operand.hbm [shape: f32[16,128], index: 0, kind: input, shape index: {}]   ;;  %s286_s1 = inlined_call_operand.hbm [shape: f32[16,128], index: 1, kind: input, shape index: {}]   ;;  %s287_s2 = inlined_call_operand.hbm [shape: f32[1,8,128], index: 2, kind: output, shape index: {0}]   ;;  %s288_s3 = inlined_call_operand.hbm [shape: f32[1,8,128], index: 3, kind: output, shape index: {1}]  }
   0x1   :  { %10 = vsyncpa [#allocation6], 0 }
   0x2   :  { %11 = vsyncpa [#allocation4], 0 }
   0x3   :  { %12 = vsyncpa [#allocation9], 0  ;;  %s204_s12 = smov [#allocation2]   ;;  %s108_s16 = scalar_lea.hbm %s285_s0, 256 }
   0x4   :  { %s18_s13 = sshll.u32 %s204_s12, 4  ;;  %p109_p0 = scmp.ne.s32.totalorder %s285_s0, %s108_s16  ;;  %s19_s13 = int_to_ptr.vmem [resolvable:$true] %s18_s13 }
   0x5   :  { %p112_p1 = scmp.lt.u32.totalorder %s108_s16, %s285_s0 }
   0x7   :  { %p114_p2 = pnand %p112_p1, %p109_p0 }
   0x9   :  { %117 = shalt.err (!%p114_p2)
}
   0xa   :  { %s118_s21 = scalar_lea.vmem %s19_s13, 256  ;;  %p123_p4 = scmp.lt.s32.totalorder %s19_s13, %s19_s13 }
   0xb   :  { %p119_p3 = scmp.ne.s32.totalorder %s19_s13, %s118_s21  ;;  %p124_p5 = scmp.lt.s32.totalorder %s118_s21, %s118_s21 }
   0xd   :  { %p125_p6 = por %p124_p5, %p123_p4 }
   0xf   :  { %p126_p7 = pnand %p125_p6, %p119_p3 }
  0x11   :  { %129 = shalt.err (!%p126_p7)
}
  0x12   :  { %s205_s22 = smov 128   ;;  %s206_s23 = smov 8  }
  0x13   :  { %24 = dma.hbm_to_vmem [thread:$0]  %s285_s0, 256, %s19_s13, [#allocation3], %s205_s22, %s205_s22, %s206_s23  }
  0x14   :  { %s207_s26 = smov [#allocation5]   ;;  %s130_s30 = scalar_lea.hbm %s286_s1, 256 }
  0x15   :  { %s30_s27 = sshll.u32 %s207_s26, 4  ;;  %p131_p8 = scmp.ne.s32.totalorder %s286_s1, %s130_s30  ;;  %s31_s27 = int_to_ptr.vmem [resolvable:$true] %s30_s27 }
  0x16   :  { %p134_p9 = scmp.lt.u32.totalorder %s130_s30, %s286_s1 }
  0x18   :  { %p136_p10 = pnand %p134_p9, %p131_p8 }
  0x1a   :  { %139 = shalt.err (!%p136_p10)
}
  0x1b   :  { %s140_s8 = scalar_lea.vmem %s31_s27, 256  ;;  %p145_p12 = scmp.lt.s32.totalorder %s31_s27, %s31_s27 }
  0x1c   :  { %p141_p11 = scmp.ne.s32.totalorder %s31_s27, %s140_s8  ;;  %p146_p13 = scmp.lt.s32.totalorder %s140_s8, %s140_s8 }
  0x1e   :  { %p147_p0 = por %p146_p13, %p145_p12 }
  0x20   :  { %p148_p1 = pnand %p147_p0, %p141_p11 }
  0x22   :  { %151 = shalt.err (!%p148_p1)
}
  0x23   :  { %36 = dma.hbm_to_vmem [thread:$0]  %s286_s1, 256, %s31_s27, [#allocation6], %s205_s22, %s205_s22, %s206_s23  }
  0x24   :  { %196 = dma.done.wait [#allocation3], 256  }
  0x25   :  { %197 = vsyncadd [#allocation3], 4294967040 }
  0x26   :  { %198 = dma.done.wait [#allocation6], 256  }
  0x27   :  { %199 = vsyncadd [#allocation6], 4294967040  ;;  %v43_v0 = vld [vmem:[#allocation5] sm:$0xff]  ;;  %v44_v1 = vld [vmem:[#allocation5 + $0x8] sm:$0xff]  ;;  %s208_s10 = smov [#allocation8]   ;;  %v209_v4 = vmov 0.0  }
  0x28   :  { %vm47_vm0 = vcmp.gt.f32.partialorder %v43_v0, 0.0  ;;  %vm48_vm1 = vcmp.gt.f32.partialorder %v44_v1, 0.0  ;;  %s83_s11 = sshll.u32 %s208_s10, 4  ;;  %v45_v6 = vld [vmem:[#allocation2] sm:$0xff]  ;;  %v46_v8 = vld [vmem:[#allocation2 + $0x8] sm:$0xff]  ;;  %s84_s11 = int_to_ptr.vmem [resolvable:$true] %s83_s11 }
  0x29   :  { %v49_v2 = vsel %vm47_vm0, %v43_v0, 1.0  ;;  %v50_v3 = vsel %vm48_vm1, %v44_v1, 1.0  ;;  %v61_v5 = vsel %vm47_vm0, 1.0, %v209_v4  ;;  %v62_v7 = vsel %vm48_vm1, 1.0, %v209_v4  ;;  %s152_s1 = scalar_lea.vmem %s84_s11, 128  ;;  %p157_p3 = scmp.lt.s32.totalorder %s84_s11, %s84_s11 }
  0x2a   :  { %104 = vrcp.f32 %v49_v2  ;;  %v65_v9 = vadd.f32 %v62_v7, %v61_v5  ;;  %v51_v10 = vsub.f32 %v43_v0, %v45_v6  ;;  %v52_v11 = vsub.f32 %v44_v1, %v46_v8  ;;  %p153_p2 = scmp.ne.s32.totalorder %s84_s11, %s152_s1  ;;  %p158_p4 = scmp.lt.s32.totalorder %s152_s1, %s152_s1 }
  0x2b   :  { %106 = vrcp.f32 %v50_v3 }
  0x2c   :  { %66 = vst [vmem:[#allocation8] sm:$0xff] %v65_v9  ;;  %p159_p5 = por %p158_p4, %p157_p3 }
  0x2e   :  { %p160_p6 = pnand %p159_p5, %p153_p2 }
  0x30   :  { %163 = shalt.err (!%p160_p6)
}
  0x31   :  { %s164_s14 = scalar_lea.hbm %s288_s3, 128 }
  0x32   :  { %p165_p7 = scmp.ne.s32.totalorder %s288_s3, %s164_s14  ;;  %p168_p8 = scmp.lt.u32.totalorder %s164_s14, %s288_s3 }
  0x34   :  { %p170_p9 = pnand %p168_p8, %p165_p7 }
  0x36   :  { %173 = shalt.err (!%p170_p9)
}
  0x37   :  { %86 = dma.vmem_to_hbm [thread:$0]  %s84_s11, 128, %s288_s3, [#allocation9]   ;;  %v53_v12 = vand.u32 2147483647, %v51_v10  ;;  %v54_v13 = vand.u32 2147483647, %v52_v11  ;;  %v105_v14 = vpop.eup %104 }
  0x38   :  { %v107_v15 = vpop.eup %106  ;;  %s210_s21 = smov [#allocation7]  }
  0x39   :  { %v56_v16 = vmul.f32 %v105_v14, %v53_v12  ;;  %v58_v17 = vmul.f32 %v107_v15, %v54_v13  ;;  %s73_s22 = sshll.u32 %s210_s21, 4  ;;  %s74_s22 = int_to_ptr.vmem [resolvable:$true] %s73_s22 }
  0x3a   :  { %s174_s23 = scalar_lea.vmem %s74_s22, 128  ;;  %p179_p11 = scmp.lt.s32.totalorder %s74_s22, %s74_s22 }
  0x3b   :  { %v59_v18 = vsel %vm47_vm0, %v56_v16, 0.0  ;;  %v60_v19 = vsel %vm48_vm1, %v58_v17, 0.0  ;;  %p175_p10 = scmp.ne.s32.totalorder %s74_s22, %s174_s23  ;;  %p180_p12 = scmp.lt.s32.totalorder %s174_s23, %s174_s23 }
  0x3c   :  { %v63_v20 = vadd.f32 %v60_v19, %v59_v18 }
  0x3d   :  { %p181_p13 = por %p180_p12, %p179_p11 }
  0x3e   :  { %64 = vst [vmem:[#allocation7] sm:$0xff] %v63_v20 }
  0x3f   :  { %p182_p0 = pnand %p181_p13, %p175_p10 }
  0x41   :  { %185 = shalt.err (!%p182_p0)
}
  0x42   :  { %s186_s25 = scalar_lea.hbm %s287_s2, 128 }
  0x43   :  { %p187_p1 = scmp.ne.s32.totalorder %s287_s2, %s186_s25  ;;  %p190_p2 = scmp.lt.u32.totalorder %s186_s25, %s287_s2 }
  0x45   :  { %p192_p3 = pnand %p190_p2, %p187_p1 }
  0x47   :  { %195 = shalt.err (!%p192_p3)
}
  0x48   :  { %76 = dma.vmem_to_hbm [thread:$0]  %s74_s22, 128, %s287_s2, [#allocation4]  }
  0x49   :  { %200 = dma.done.wait [#allocation4], 128  }
  0x4a   :  { %201 = vsyncadd [#allocation4], 4294967168 }
  0x4b   :  { %202 = dma.done.wait [#allocation9], 128  }
  0x4c   :  { %203 = vsyncadd [#allocation9], 4294967168 }
  0x4d   :  { %93 = vsyncpa [#allocation3], 1 }
  0x4e   :  { %94 = vsyncpa [#allocation6], 1 }
  0x4f   :  { %95 = vsyncpa [#allocation4], 1 }
  0x50   :  { %96 = vsyncpa [#allocation9], 1 }

</bundles_post_ra>
